<compile_context>
chip_gen: v7x
topology: tpu7x:2x2x1
jax: 0.10.0
libtpu: 0.0.40
codegen_flags: <defaults>
</compile_context>

<pallas_src>
import functools

import jax
import jax.numpy as jnp
from jax.experimental import pallas as pl
from jax.experimental.pallas import tpu as pltpu

_P_NORM = 2.4                           # lp_loss exponent used by the 'mse' search

# --- tiling policy ---------------------------------------------------------
_SINGLE_BLOCK_BYTES = 1 * 1024 * 1024   # whole-array one-step path below this size
_TARGET_BLOCK_BYTES = 4 * 1024 * 1024   # ~4 MiB per x block in the tiled path
_MAX_LANE_TILE = 8192                   # cap on lane (F) tile width (elements)


def _round_up(n, m):
    return ((n + m - 1) // m) * m


@functools.lru_cache(maxsize=1)
def _vmem_limit_bytes():
    """Half of physical VMEM, capped at 64 MiB (v6e: 64 MiB, v7x: 32 MiB)."""
    try:
        info = pltpu.get_tpu_info()
        cap = getattr(info, "vmem_capacity_bytes", None)
        if cap:
            return int(min(cap // 2, 64 * 1024 * 1024))
    except Exception:
        pass
    return 32 * 1024 * 1024


def _sublane_unit(dtype):
    """C-axis tiling unit: 8 for f32, 16 for bf16, 32 for int8/fp8."""
    return max(8, 32 // jnp.dtype(dtype).itemsize)


# ---------------------------------------------------------------------------
# Pallas kernel: fake quant-dequant with zero-point folded into the clip bounds
# ---------------------------------------------------------------------------
def _qdq_kernel(x_ref, s_ref, o_ref):
    x = x_ref[...].astype(jnp.float32)      # native HBM dtype -> f32 on the vreg
    inv_d = s_ref[:, 0:1]                   # (tc, 1) 1/delta, broadcast along lanes
    d = s_ref[:, 1:2]                       # (tc, 1) delta
    lo = s_ref[:, 2:3]                      # (tc, 1) -zero_point
    hi = s_ref[:, 3:4]                      # (tc, 1) qmax - zero_point
    x_int = jnp.round(x * inv_d)            # round_ste forward value == round
    o_ref[...] = (jnp.clip(x_int, lo, hi) * d).astype(o_ref.dtype)


def _pack_scales(delta_c, zp_c, n_levels):
    """(C,) delta / zero_point -> (C, 4) f32 [1/d, d, -zp, qmax - zp]."""
    d = delta_c.astype(jnp.float32)
    zp = zp_c.astype(jnp.float32)
    qmax = jnp.float32(n_levels - 1)
    return jnp.stack([1.0 / d, d, -zp, qmax - zp], axis=1)


def quant_dequant_from_scales(x2d, scales, donate=False):
    """Fake quant-dequant of x2d (C, F) using packed (C, 4) scale columns."""
    C, F = x2d.shape
    dtype = x2d.dtype
    itemsize = jnp.dtype(dtype).itemsize
    io_alias = {0: 0} if donate else {}
    vmem_limit = _vmem_limit_bytes()

    # Fast path: whole tensor as one VMEM block (block == full array, so no (8,128)
    # divisibility requirement, no padding, no grid overhead).
    if C * F * itemsize <= _SINGLE_BLOCK_BYTES:
        return pl.pallas_call(
            _qdq_kernel,
            out_shape=jax.ShapeDtypeStruct((C, F), dtype),
            input_output_aliases=io_alias,
            compiler_params=pltpu.CompilerParams(vmem_limit_bytes=vmem_limit),
        )(x2d, scales)

    # Tiled path: fixed lane-wide blocks, pl.cdiv grid (edge blocks masked by Pallas).
    sub = _sublane_unit(dtype)
    tf = min(_MAX_LANE_TILE, _round_up(F, 128))
    tc_raw = max(1, _TARGET_BLOCK_BYTES // (tf * itemsize))
    tc = max(sub, (tc_raw // sub) * sub)
    tc = min(tc, _round_up(C, sub))
    # Ensure >=2 blocks on the parallel C axis when the grid would otherwise be
    # (1, 1): enables pipelining and v7x 2-TensorCore sharding for mid-size tensors.
    if pl.cdiv(C, tc) == 1 and pl.cdiv(F, tf) == 1 and C >= 2 * sub:
        tc = _round_up(-(-C // 2), sub)
    grid = (pl.cdiv(C, tc), pl.cdiv(F, tf))  # F innermost: scale columns stay resident

    return pl.pallas_call(
        _qdq_kernel,
        out_shape=jax.ShapeDtypeStruct((C, F), dtype),
        grid=grid,
        in_specs=[
            pl.BlockSpec((tc, tf), lambda i, j: (i, j)),
            pl.BlockSpec((tc, 4), lambda i, j: (i, 0)),
        ],
        out_specs=pl.BlockSpec((tc, tf), lambda i, j: (i, j)),
        input_output_aliases=io_alias,
        compiler_params=pltpu.CompilerParams(
            dimension_semantics=("parallel", "parallel"),
            vmem_limit_bytes=vmem_limit),
    )(x2d, scales)


def quant_dequant(x2d, delta_c, zp_c, n_levels, donate=False):
    """Fake quant-dequant of x2d (C, F) with per-row delta / zero_point (C,)."""
    return quant_dequant_from_scales(x2d, _pack_scales(delta_c, zp_c, n_levels),
                                     donate=donate)


# ---------------------------------------------------------------------------
# One-time scale initialization ('mse' scale_method) — plain JAX parameter setup
# ---------------------------------------------------------------------------
def _lp_score(x, x_fq):
    # lp_loss(..., p=2.4, reduction='all')
    return jnp.mean(jnp.abs(x - x_fq) ** _P_NORM)


def _sym_candidates_init(x_flat, *, bit):
    L = float(2 ** bit)
    zp_quant = float(2 ** (bit - 1) - 1)
    x_absmax = jnp.max(jnp.abs(x_flat))
    x_min = jnp.min(x_flat)
    i = jnp.arange(80, dtype=jnp.float32)
    new_max = x_absmax * (1.0 - i * 0.01)
    delta_c = 2.0 * new_max / (L - 1.0)

    # TODO(synk): for very large layers switch this vmap(80) to lax.map / running
    # argmin to cut the one-time init peak memory ~80x.
    def score_one(d):
        x_int = jnp.round(x_flat / d)
        x_q = jnp.clip(x_int + zp_quant, 0.0, L - 1.0)
        x_fq = (x_q - zp_quant) * d
        return _lp_score(x_flat, x_fq)

    scores = jax.vmap(score_one)(delta_c)
    scores = jnp.where(jnp.isnan(scores), jnp.inf, scores)
    best = jnp.argmin(scores)
    ok = scores[best] < 100000.0
    delta = jnp.where(ok, delta_c[best], 1.0)
    zero_point = jnp.where(ok, jnp.where(x_min < 0, zp_quant, 0.0), 0.0)
    return delta, zero_point


def _asym_candidates_init(x_flat, *, bit):
    L = float(2 ** bit)
    x_max = jnp.max(x_flat)
    x_min = jnp.min(x_flat)
    x_mean = jnp.mean(x_flat)
    step_left = (x_mean - x_min) / 100.0
    step_right = (x_max - x_mean) / 100.0
    i = jnp.arange(80, dtype=jnp.float32)
    new_min = x_mean - step_left * i
    new_max = x_mean + step_right * i
    delta_c = (new_max - new_min) / (L - 1.0)
    zp_c = jnp.round(-new_min / delta_c)

    def score_one(d, zp):
        x_int = jnp.round(x_flat / d)
        x_q = jnp.clip(x_int + zp, 0.0, L - 1.0)
        x_fq = (x_q - zp) * d
        return _lp_score(x_flat, x_fq)

    scores = jax.vmap(score_one)(delta_c, zp_c)
    scores = jnp.where(jnp.isnan(scores), jnp.inf, scores)
    best = jnp.argmin(scores)
    ok = scores[best] < 100000.0
    delta = jnp.where(ok, delta_c[best], 1.0)
    zp_best = jnp.where(new_min[best] < 0,
                        jnp.round(-new_min[best] / delta_c[best]), 0.0)
    zero_point = jnp.where(ok, zp_best, 0.0)
    return delta, zero_point


# ---------------------------------------------------------------------------
# Module
# ---------------------------------------------------------------------------
class UniformAffineQuantizerForWeight:
    def __init__(self, n_bits: int = 8, symmetric: bool = False,
                 channel_wise: bool = False, scale_method: str = 'mse',
                 leaf_param: bool = False):
        # NOTE: the reference __init__ forwards only (scale_method, leaf_param) to the
        # base class, so effective defaults are n_bits=8, sym=True, channel_wise=False.
        del n_bits, symmetric, channel_wise
        self.scale_method = scale_method
        self.leaf_param = leaf_param
        self.n_bits = 8
        self.n_levels = 2 ** self.n_bits
        self.sym = True
        self.channel_wise = False
        self.inited = False
        self.delta_set_sym_channel = None
        self.zero_point_set_sym_channel = None
        self.delta_set_asym_channel = None
        self.zero_point_set_asym_channel = None
        self.delta_set_sym_layer = None
        self.zero_point_set_sym_layer = None
        self.delta_set_asym_layer = None
        self.zero_point_set_asym_layer = None
        self._fwd_cache = {}

    def set_quantization_bit(self, bit: int):
        assert 2 <= bit <= 8, 'bitwidth not supported'
        self.n_bits = bit
        self.n_levels = 2 ** self.n_bits

    def set_quantization_params(self, bit, symmetric, channel_wise=None):
        self.n_bits = bit
        self.n_levels = 2 ** self.n_bits
        self.sym = symmetric
        self.channel_wise = channel_wise

    def init_quantization_scale(self, x):
        x = jnp.asarray(x, jnp.float32)
        C = x.shape[0]
        x_ch = x.reshape(C, -1)
        x_all = x.reshape(-1)
        dsc, zsc, dac, zac = [], [], [], []
        dsl, zsl, dal, zal = [], [], [], []
        for bit in range(2, 9):
            d_s, z_s = jax.vmap(functools.partial(_sym_candidates_init, bit=bit))(x_ch)
            d_a, z_a = jax.vmap(functools.partial(_asym_candidates_init, bit=bit))(x_ch)
            dsc.append(d_s); zsc.append(z_s); dac.append(d_a); zac.append(z_a)
            ds_l, zs_l = _sym_candidates_init(x_all, bit=bit)
            da_l, za_l = _asym_candidates_init(x_all, bit=bit)
            dsl.append(ds_l); zsl.append(zs_l); dal.append(da_l); zal.append(za_l)
        self.delta_set_sym_channel = jnp.stack(dsc, axis=1)        # (C, 7)
        self.zero_point_set_sym_channel = jnp.stack(zsc, axis=1)
        self.delta_set_asym_channel = jnp.stack(dac, axis=1)
        self.zero_point_set_asym_channel = jnp.stack(zac, axis=1)
        self.delta_set_sym_layer = jnp.stack(dsl)[None, :]         # (1, 7)
        self.zero_point_set_sym_layer = jnp.stack(zsl)[None, :]
        self.delta_set_asym_layer = jnp.stack(dal)[None, :]
        self.zero_point_set_asym_layer = jnp.stack(zal)[None, :]
        self._fwd_cache = {}

    def _get_scales(self, C):
        """Packed (C, 4) [1/d, d, -zp, qmax-zp], cached per quantization config."""
        key = (self.n_bits, bool(self.sym), bool(self.channel_wise), C)
        if key in self._fwd_cache:
            return self._fwd_cache[key]
        idx = self.n_bits - 2
        if self.channel_wise:
            if self.sym:
                delta_set = self.delta_set_sym_channel[:, idx]
                zp_set = self.zero_point_set_sym_channel[:, idx]
            else:
                delta_set = self.delta_set_asym_channel[:, idx]
                zp_set = self.zero_point_set_asym_channel[:, idx]
        else:
            if self.sym:
                delta_set = self.delta_set_sym_layer[:, idx]
                zp_set = self.zero_point_set_sym_layer[:, idx]
            else:
                delta_set = self.delta_set_asym_layer[:, idx]
                zp_set = self.zero_point_set_asym_layer[:, idx]
        delta_set = jnp.abs(delta_set)            # grad_scale forward value == abs(x)
        if delta_set.shape[0] != C:               # layer-wise: broadcast scalar
            delta_vec = jnp.broadcast_to(delta_set, (C,)).astype(jnp.float32)
            zp_vec = jnp.broadcast_to(zp_set, (C,)).astype(jnp.float32)
        else:                                     # channel-wise
            delta_vec = delta_set.astype(jnp.float32)
            zp_vec = zp_set.astype(jnp.float32)
        scales = _pack_scales(delta_vec, zp_vec, self.n_levels)
        self._fwd_cache[key] = scales
        return scales

    def __call__(self, x):
        x = jnp.asarray(x)
        if not self.inited:
            self.init_quantization_scale(x)
            self.inited = True
        if x.ndim not in (2, 4):
            raise ValueError('shape error')

        # TODO(synk): round_ste / grad_scale are forward-only here (no custom_vjp STE);
        # gradients through the quantizer would differ from the PyTorch reference.
        # TODO(synk): reference does `delta = float(delta)` when leaf_param=False;
        # forward values are identical, so delta is kept as an array here.
        C = x.shape[0]
        scales = self._get_scales(C)
        x2d = x.reshape(C, -1)                     # native dtype; cast happens in-kernel
        out = quant_dequant_from_scales(x2d, scales)
        return out.reshape(x.shape)


# ---------------------------------------------------------------------------
if __name__ == "__main__":
    key = jax.random.PRNGKey(0)
    k1, k2, k3, k4, k5 = jax.random.split(key, 5)

    # --- Path 1: module forward on a small conv weight (OIHW) -> single-block path.
    x = jax.random.normal(k1, (8, 4, 3, 3), dtype=jnp.float32) * 0.1
    quantizer = UniformAffineQuantizerForWeight()
    y = jax.block_until_ready(quantizer(x))

    idx = quantizer.n_bits - 2
    delta = jnp.abs(quantizer.delta_set_sym_layer[0, idx]).astype(jnp.float32)
    zp = quantizer.zero_point_set_sym_layer[0, idx].astype(jnp.float32)
    qmax = float(quantizer.n_levels - 1)
    x_int = jnp.round(x.astype(jnp.float32) * (1.0 / delta)) + zp
    x_quant = jnp.clip(x_int, 0.0, qmax)
    y_ref = ((x_quant - zp) * delta).astype(x.dtype)
    assert y.shape == x.shape and y.dtype == x.dtype
    assert bool(jnp.allclose(y, y_ref, atol=1e-6)), "single-block path mismatch"

    # --- Path 2: tiled f32 path with ragged F (exercises cdiv grid + masked edges).
    w = jax.random.normal(k2, (1024, 1500), dtype=jnp.float32) * 0.05
    d_c = jax.random.uniform(k3, (1024,), jnp.float32, minval=1e-3, maxval=2e-3)
    z_c = jnp.round(jax.random.uniform(k4, (1024,), jnp.float32, minval=0.0, maxval=255.0))
    yt = jax.block_until_ready(quant_dequant(w, d_c, z_c, 256))
    wi = jnp.round(w * (1.0 / d_c)[:, None]) + z_c[:, None]
    wq = jnp.clip(wi, 0.0, 255.0)
    yt_ref = (wq - z_c[:, None]) * d_c[:, None]
    assert yt.shape == w.shape and yt.dtype == w.dtype
    assert bool(jnp.allclose(yt, yt_ref, atol=1e-6)), "tiled f32 path mismatch"

    # --- Path 3: tiled bf16 path with ragged C (16-sublane tiling, masked C edge).
    wb = (jax.random.normal(k5, (600, 2048), dtype=jnp.float32) * 0.05).astype(jnp.bfloat16)
    d_b = jnp.full((600,), 1.5e-3, jnp.float32)
    z_b = jnp.full((600,), 127.0, jnp.float32)
    yb = jax.block_until_ready(quant_dequant(wb, d_b, z_b, 256))
    wbi = jnp.round(wb.astype(jnp.float32) * (1.0 / d_b)[:, None]) + z_b[:, None]
    wbq = jnp.clip(wbi, 0.0, 255.0)
    yb_ref = ((wbq - z_b[:, None]) * d_b[:, None]).astype(jnp.bfloat16)
    assert yb.shape == wb.shape and yb.dtype == wb.dtype
    assert bool(jnp.allclose(yb.astype(jnp.float32), yb_ref.astype(jnp.float32),
                             atol=1e-2)), "tiled bf16 path mismatch"

    print("KERNEL_OK")
</pallas_src>

<mosaic_0001>
module attributes {stable_mosaic.version = 11 : i64} {
  func.func @_qdq_kernel(%arg0: memref<8x36xf32, #tpu.memory_space<vmem>>, %arg1: memref<8x4xf32, #tpu.memory_space<vmem>>, %arg2: memref<8x36xf32, #tpu.memory_space<vmem>>) attributes {dimension_semantics = [], scalar_prefetch = 0 : i64, scratch_operands = 0 : i64, tpu.core_type = #tpu.core_type<tc>} {
    %c0 = arith.constant 0 : index
    %c0_0 = arith.constant 0 : index
    %0 = vector.load %arg0[%c0, %c0_0] : memref<8x36xf32, #tpu.memory_space<vmem>>, vector<8x36xf32>
    %c0_1 = arith.constant 0 : index
    %c0_2 = arith.constant 0 : index
    %1 = vector.load %arg1[%c0_1, %c0_2] : memref<8x4xf32, #tpu.memory_space<vmem>>, vector<8x1xf32>
    %c0_3 = arith.constant 0 : index
    %c1 = arith.constant 1 : index
    %2 = vector.load %arg1[%c0_3, %c1] : memref<8x4xf32, #tpu.memory_space<vmem>>, vector<8x1xf32>
    %c0_4 = arith.constant 0 : index
    %c2 = arith.constant 2 : index
    %3 = vector.load %arg1[%c0_4, %c2] : memref<8x4xf32, #tpu.memory_space<vmem>>, vector<8x1xf32>
    %c0_5 = arith.constant 0 : index
    %c3 = arith.constant 3 : index
    %4 = vector.load %arg1[%c0_5, %c3] : memref<8x4xf32, #tpu.memory_space<vmem>>, vector<8x1xf32>
    %5 = vector.broadcast %1 : vector<8x1xf32> to vector<8x36xf32>
    %6 = arith.mulf %0, %5 : vector<8x36xf32>
    %7 = math.roundeven %6 : vector<8x36xf32>
    %8 = vector.broadcast %3 : vector<8x1xf32> to vector<8x36xf32>
    %9 = arith.maximumf %8, %7 : vector<8x36xf32>
    %10 = vector.broadcast %4 : vector<8x1xf32> to vector<8x36xf32>
    %11 = arith.minimumf %10, %9 : vector<8x36xf32>
    %12 = vector.broadcast %2 : vector<8x1xf32> to vector<8x36xf32>
    %13 = arith.mulf %11, %12 : vector<8x36xf32>
    %c0_6 = arith.constant 0 : index
    %c0_7 = arith.constant 0 : index
    %14 = vector.load %arg2[%c0_6, %c0_7] : memref<8x36xf32, #tpu.memory_space<vmem>>, vector<8x36xf32>
    tpu.vector_store %arg2[%c0_6, %c0_7], %13 {strides = array<i32>} : memref<8x36xf32, #tpu.memory_space<vmem>>, vector<8x36xf32>,
    return
  }
}

</mosaic_0001>

<bundles_post_ra>
// kernel: tpu_custom_call.1
= control target key start
LH: loop header
LB: loop body
LE: loop exit
PB: predicated region body
PF: predicated region fallthrough
CT: control target
= control target key end

     0   :  { %v87_v1 = vmov 0   ;;  %v88_v2 = vmov 3   ;;  %s125_s0 = inlined_call_operand.vmem [shape: f32[8,36], index: 0, kind: input, shape index: {}]   ;;  %s126_s1 = inlined_call_operand.vmem [shape: f32[8,4], index: 1, kind: input, shape index: {}]   ;;  %s127_s2 = inlined_call_operand.hbm [shape: f32[8,36], index: 2, kind: output, shape index: {}]  }
   0x1   :  { %v13_v0 = vld [vmem:[%s126_s1] sm:$0xff]  ;;  %58 = vset.pattern.permute.xlu0 %v87_v1  ;;  %60 = vset.pattern.permute.xlu1 %v88_v2 }
   0x2   :  { %7 = vsyncpa [#allocation3], 0  ;;  %16 = vperm.xlu0 %58, %v13_v0   ;;  %27 = vperm.xlu1 %60, %v13_v0   ;;  %v89_v3 = vmov 2   ;;  %v90_v4 = vmov 1   ;;  %v12_v5 = vld [vmem:[%s125_s0] sm:$0xff]  ;;  %s91_s1 = smov [#allocation2]  }
   0x3   :  { %s44_s13 = sshll.u32 %s91_s1, 4  ;;  %vm36_vm0 = vcmask 293888   ;;  %s45_s13 = int_to_ptr.vmem [resolvable:$true] %s44_s13 }
   0x4   :  { %s63_s14 = scalar_lea.vmem %s45_s13, 128  ;;  %p68_p1 = scmp.lt.s32.totalorder %s45_s13, %s45_s13 }
   0x5   :  { %p64_p0 = scmp.ne.s32.totalorder %s45_s13, %s63_s14  ;;  %p69_p2 = scmp.lt.s32.totalorder %s63_s14, %s63_s14 }
   0x6   :  { %59 = vset.pattern.permute.xlu0 %v89_v3  ;;  %61 = vset.pattern.permute.xlu1 %v90_v4 }
   0x7   :  { %22 = vperm.xlu0 %59, %v13_v0   ;;  %32 = vperm.xlu1 %61, %v13_v0   ;;  %p70_p3 = por %p69_p2, %p68_p1 }
   0x9   :  { %p71_p4 = pnand %p70_p3, %p64_p0 }
   0xb   :  { %62 = vset.pattern.permute.xlu0 %v90_v4 }
  0x81   :  { %v17_v6 = vpop.permute.xlu0 %16  ;;  %v28_v8 = vpop.permute.xlu1 %27 }
  0x82   :  { %v19_v7 = vmul.f32 %v17_v6, %v12_v5 }
  0x84   :  { %v52_v9 = vround.rtne.f32 %v19_v7 }
  0x86   :  { %v23_v10 = vpop.permute.xlu0 %22  ;;  %v33_v12 = vpop.permute.xlu1 %32 }
  0x87   :  { %v25_v11 = vmax.f32 %v23_v10, %v52_v9 }
  0x89   :  { %v30_v13 = vmin.f32 %v28_v8, %v25_v11 }
  0x8b   :  { %v35_v14 = vmul.f32 %v33_v12, %v30_v13 }
  0x8d   :  { %37 = vst.msk [vmem:[#allocation2] sm:$0xff] %vm36_vm0, %v35_v14 }
  0x8e   :  { %74 = shalt.err (!%p71_p4)
}
  0x8f   :  { %s75_s16 = scalar_lea.hbm %s127_s2, 128 }
  0x90   :  { %p76_p5 = scmp.ne.s32.totalorder %s127_s2, %s75_s16  ;;  %p79_p6 = scmp.lt.u32.totalorder %s75_s16, %s127_s2 }
  0x92   :  { %p81_p7 = pnand %p79_p6, %p76_p5 }
  0x94   :  { %84 = shalt.err (!%p81_p7)
}
  0x95   :  { %47 = dma.vmem_to_hbm [thread:$0]  %s45_s13, 128, %s127_s2, [#allocation3]  }
  0x96   :  { %85 = dma.done.wait [#allocation3], 128  }
  0x97   :  { %86 = vsyncadd [#allocation3], 4294967168 }
  0x98   :  { %51 = vsyncpa [#allocation3], 1 }

</bundles_post_ra>
